<compile_context>
chip_gen: v7x
topology: tpu7x:2x2x1
jax: 0.10.0
libtpu: 0.0.40
codegen_flags: <defaults>
</compile_context>

<pallas_src>
import jax
import jax.numpy as jnp
from jax.experimental import pallas as pl
from jax.experimental.pallas import tpu as pltpu


# ---------------------------------------------------------------------------
# Pass 1: conv1 = relu(A_hat @ X @ W1 + b1), row-tiled over nodes.
# (A_tile @ X) @ W1 order needs no full X@W1 intermediate, so row tiles are
# fully independent -> "parallel" grid axis.
# ---------------------------------------------------------------------------
def conv1_kernel(a_ref, x_ref, w1_ref, b1_ref, h1_ref):
    ax = jnp.dot(a_ref[...], x_ref[...], preferred_element_type=jnp.float32)
    h1 = jnp.dot(ax.astype(jnp.bfloat16), w1_ref[...],
                 preferred_element_type=jnp.float32)
    h1 = jnp.maximum(h1 + b1_ref[...], 0.0)          # epilogue in f32
    h1_ref[...] = h1.astype(h1_ref.dtype)            # store H1 as bf16


# ---------------------------------------------------------------------------
# Pass 2: conv2 + global_mean_pool + Linear, row-tiled over nodes.
# Pooled (B, H) accumulator lives in VMEM scratch across the (reduction) grid.
#   per tile i:  h2 = (A[i] @ H1) @ W2 + b2 ;  pooled += P[:, tile_i] @ h2
#   last tile :  out = pooled @ WL + bl
# ---------------------------------------------------------------------------
def conv2_pool_lin_kernel(a_ref, h1_ref, w2_ref, b2_ref, p_ref,
                          wl_ref, bl_ref, out_ref, pooled_acc):
    i = pl.program_id(0)

    @pl.when(i == 0)
    def _():
        pooled_acc[...] = jnp.zeros_like(pooled_acc)

    ah1 = jnp.dot(a_ref[...], h1_ref[...], preferred_element_type=jnp.float32)
    h2 = jnp.dot(ah1.astype(jnp.bfloat16), w2_ref[...],
                 preferred_element_type=jnp.float32) + b2_ref[...]

    pooled_acc[...] += jnp.dot(p_ref[...], h2.astype(jnp.bfloat16),
                               preferred_element_type=jnp.float32)

    @pl.when(i == pl.num_programs(0) - 1)
    def _():
        # TODO(synk): dropout(p=0.5) is identity in eval mode; training-mode
        # dropout (pltpu.prng_seed / prng_random_bits mask) not emitted.
        out_ref[...] = (jnp.dot(pooled_acc[...].astype(jnp.bfloat16),
                                wl_ref[...],
                                preferred_element_type=jnp.float32)
                        + bl_ref[...])


def simple_gcn_forward(x, a_hat, pool_mat, params, *, tile_m=128):
    """x: (N, F_in) f32, a_hat: (N, N) f32, pool_mat: (B, N) f32."""
    w1, b1, w2, b2, wl, bl = params
    N, F_in = x.shape
    H = w1.shape[1]
    B = pool_mat.shape[0]
    C = wl.shape[1]
    assert N % tile_m == 0, "N must be a multiple of tile_m"
    assert tile_m % 128 == 0, "tile_m must be lane-aligned (multiple of 128)"

    # bf16 at the kernel boundary (MXU-native on v5e/v6e/v7x); biases stay f32.
    bf = jnp.bfloat16
    a_bf = a_hat.astype(bf)
    x_bf = x.astype(bf)
    w1_bf, w2_bf, wl_bf = w1.astype(bf), w2.astype(bf), wl.astype(bf)
    p_bf = pool_mat.astype(bf)

    grid = (N // tile_m,)

    def resident(shape):
        return pl.BlockSpec(shape, lambda i: tuple(0 for _ in shape))

    # Explicit scoped-VMEM budget (re-derive when tiles grow; keep << 64 MiB
    # physical on v7x once A_hat row tiles get large).
    vmem_limit = 32 * 1024 * 1024

    # ---- pass 1: H1 = relu(A_hat @ X @ W1 + b1) -------------------------------
    h1 = pl.pallas_call(
        conv1_kernel,
        out_shape=jax.ShapeDtypeStruct((N, H), bf),
        grid=grid,
        in_specs=[
            pl.BlockSpec((tile_m, N), lambda i: (i, 0)),   # A_hat row tile
            resident((N, F_in)),                           # X (resident)
            resident((F_in, H)),                           # W1
            resident((1, H)),                              # b1 (f32)
        ],
        out_specs=pl.BlockSpec((tile_m, H), lambda i: (i, 0)),
        compiler_params=pltpu.CompilerParams(
            dimension_semantics=("parallel",),
            vmem_limit_bytes=vmem_limit),
    )(a_bf, x_bf, w1_bf, b1)

    # ---- pass 2: conv2 + mean pool + linear -----------------------------------
    out = pl.pallas_call(
        conv2_pool_lin_kernel,
        out_shape=jax.ShapeDtypeStruct((B, C), jnp.float32),
        grid=grid,
        in_specs=[
            pl.BlockSpec((tile_m, N), lambda i: (i, 0)),   # A_hat row tile
            resident((N, H)),                              # H1 (resident, bf16)
            resident((H, H)),                              # W2
            resident((1, H)),                              # b2 (f32)
            pl.BlockSpec((B, tile_m), lambda i: (0, i)),   # pool matrix columns
            resident((H, C)),                              # WL
            resident((1, C)),                              # bl (f32)
        ],
        out_specs=resident((B, C)),
        scratch_shapes=[pltpu.VMEM((B, H), jnp.float32)],  # pooled accumulator
        compiler_params=pltpu.CompilerParams(
            dimension_semantics=("arbitrary",),            # reduction over row tiles
            vmem_limit_bytes=vmem_limit),
    )(a_bf, h1, w2_bf, b2, p_bf, wl_bf, bl)
    return out


def build_normalized_adjacency(edge_index, num_nodes):
    """Dense D^-1/2 (A + I) D^-1/2, aggregation direction src -> dst."""
    src, dst = edge_index[0], edge_index[1]
    a = jnp.zeros((num_nodes, num_nodes), jnp.float32)
    a = a.at[dst, src].set(1.0)                    # message flows src -> dst
    a = a + jnp.eye(num_nodes, dtype=jnp.float32)  # self-loops
    deg = jnp.sum(a, axis=1)
    dinv = jnp.where(deg > 0, 1.0 / jnp.sqrt(deg), 0.0)
    return dinv[:, None] * a * dinv[None, :]


def build_pool_matrix(batch, num_graphs):
    """(B, N) mean-pool matrix: P[b, i] = 1/|graph_b| if batch[i] == b."""
    onehot = (batch[None, :] == jnp.arange(num_graphs)[:, None]).astype(jnp.float32)
    counts = jnp.maximum(jnp.sum(onehot, axis=1, keepdims=True), 1.0)
    return onehot / counts


if __name__ == "__main__":
    # batched, deterministic problem: 16 ring graphs x 16 nodes
    N_PER_GRAPH = 16
    N_GRAPHS = 16
    N_NODES = N_PER_GRAPH * N_GRAPHS   # 256
    F_IN = 8                           # input_feature
    HIDDEN = 32                        # hidden_channels
    NUM_CLASSES = 4                    # num_classes
    TILE_M = 128                       # node-row tile -> grid=(2,)

    key = jax.random.PRNGKey(0)
    k_x, k_w1, k_b1, k_w2, k_b2, k_wl, k_bl = jax.random.split(key, 7)

    # node features
    x = jax.random.normal(k_x, (N_NODES, F_IN), dtype=jnp.float32)

    # ring graphs, symmetric edges
    def ring_edges(offset, n):
        s = jnp.arange(n) + offset
        d = (jnp.arange(n) + 1) % n + offset
        return jnp.stack([jnp.concatenate([s, d]), jnp.concatenate([d, s])])

    edge_index = jnp.concatenate(
        [ring_edges(g * N_PER_GRAPH, N_PER_GRAPH) for g in range(N_GRAPHS)], axis=1)
    batch = jnp.repeat(jnp.arange(N_GRAPHS, dtype=jnp.int32), N_PER_GRAPH)

    # deterministic parameters; conv3 exists in __init__ but is unused in
    # forward, so it is not instantiated here.
    def init(k, shape, fan_in):
        return (jax.random.normal(k, shape, dtype=jnp.float32)
                / jnp.sqrt(jnp.float32(fan_in)))

    w1 = init(k_w1, (F_IN, HIDDEN), F_IN)
    b1 = 0.1 * jax.random.normal(k_b1, (1, HIDDEN), dtype=jnp.float32)
    w2 = init(k_w2, (HIDDEN, HIDDEN), HIDDEN)
    b2 = 0.1 * jax.random.normal(k_b2, (1, HIDDEN), dtype=jnp.float32)
    wl = init(k_wl, (HIDDEN, NUM_CLASSES), HIDDEN)
    bl = 0.1 * jax.random.normal(k_bl, (1, NUM_CLASSES), dtype=jnp.float32)
    params = (w1, b1, w2, b2, wl, bl)

    a_hat = build_normalized_adjacency(edge_index, N_NODES)
    pool_mat = build_pool_matrix(batch, N_GRAPHS)

    out = simple_gcn_forward(x, a_hat, pool_mat, params, tile_m=TILE_M)
    out = jax.block_until_ready(out)

    # pure-JAX reference with the SAME bf16 cast points / f32 accumulation
    bfc = jnp.bfloat16
    ab, xb = a_hat.astype(bfc), x.astype(bfc)
    w1b, w2b, wlb = w1.astype(bfc), w2.astype(bfc), wl.astype(bfc)
    pb = pool_mat.astype(bfc)

    ax = jnp.dot(ab, xb, preferred_element_type=jnp.float32)
    h1 = jnp.maximum(jnp.dot(ax.astype(bfc), w1b,
                             preferred_element_type=jnp.float32) + b1, 0.0).astype(bfc)
    ah1 = jnp.dot(ab, h1, preferred_element_type=jnp.float32)
    h2 = jnp.dot(ah1.astype(bfc), w2b, preferred_element_type=jnp.float32) + b2
    pooled = jnp.dot(pb, h2.astype(bfc), preferred_element_type=jnp.float32)
    ref = jnp.dot(pooled.astype(bfc), wlb, preferred_element_type=jnp.float32) + bl

    assert out.shape == (N_GRAPHS, NUM_CLASSES)
    assert jnp.allclose(out, ref, atol=1e-2, rtol=1e-2), float(jnp.max(jnp.abs(out - ref)))

    print("KERNEL_OK")
</pallas_src>

<mosaic_0001>
module attributes {stable_mosaic.version = 11 : i64} {
  func.func @conv1_kernel(%arg0: i32, %arg1: memref<128x256xbf16, #tpu.memory_space<vmem>>, %arg2: memref<256x8xbf16, #tpu.memory_space<vmem>>, %arg3: memref<8x32xbf16, #tpu.memory_space<vmem>>, %arg4: memref<1x32xf32, #tpu.memory_space<vmem>>, %arg5: memref<128x32xbf16, #tpu.memory_space<vmem>>) attributes {dimension_semantics = [#tpu.dimension_semantics<parallel>], iteration_bounds = array<i64: 2>, scalar_prefetch = 0 : i64, scratch_operands = 0 : i64, tpu.core_type = #tpu.core_type<tc>, window_params = [{transform_indices = @transform_0, window_bounds = array<i64: 128, 256>}, {pipeline_mode = #tpu.pipeline_mode<synchronous>, transform_indices = @transform_1, window_bounds = array<i64: 256, 8>}, {pipeline_mode = #tpu.pipeline_mode<synchronous>, transform_indices = @transform_2, window_bounds = array<i64: 8, 32>}, {pipeline_mode = #tpu.pipeline_mode<synchronous>, transform_indices = @transform_3, window_bounds = array<i64: 1, 32>}, {transform_indices = @transform_4, window_bounds = array<i64: 128, 32>}]} {
    %c0 = arith.constant 0 : index
    %c0_0 = arith.constant 0 : index
    %0 = vector.load %arg1[%c0, %c0_0] : memref<128x256xbf16, #tpu.memory_space<vmem>>, vector<128x256xbf16>
    %c0_1 = arith.constant 0 : index
    %c0_2 = arith.constant 0 : index
    %1 = vector.load %arg2[%c0_1, %c0_2] : memref<256x8xbf16, #tpu.memory_space<vmem>>, vector<256x8xbf16>
    %cst = arith.constant dense<0.000000e+00> : vector<128x8xf32>
    %2 = tpu.matmul %0, %1, %cst {dimension_numbers = #tpu.dot_dimension_numbers<[1], [0], [0], [1], [0, 0, 1, 1], [], []>} : vector<128x256xbf16>, vector<256x8xbf16>, vector<128x8xf32> -> vector<128x8xf32>
    %3 = arith.truncf %2 : vector<128x8xf32> to vector<128x8xbf16>
    %c0_3 = arith.constant 0 : index
    %c0_4 = arith.constant 0 : index
    %4 = vector.load %arg3[%c0_3, %c0_4] : memref<8x32xbf16, #tpu.memory_space<vmem>>, vector<8x32xbf16>
    %cst_5 = arith.constant dense<0.000000e+00> : vector<128x32xf32>
    %5 = tpu.matmul %3, %4, %cst_5 {dimension_numbers = #tpu.dot_dimension_numbers<[1], [0], [0], [1], [0, 0, 1, 1], [], []>} : vector<128x8xbf16>, vector<8x32xbf16>, vector<128x32xf32> -> vector<128x32xf32>
    %c0_6 = arith.constant 0 : index
    %c0_7 = arith.constant 0 : index
    %6 = vector.load %arg4[%c0_6, %c0_7] : memref<1x32xf32, #tpu.memory_space<vmem>>, vector<1x32xf32>
    %7 = vector.broadcast %6 : vector<1x32xf32> to vector<128x32xf32>
    %8 = arith.addf %5, %7 : vector<128x32xf32>
    %cst_8 = arith.constant 0.000000e+00 : f32
    %9 = vector.broadcast %cst_8 : f32 to vector<128x32xf32>
    %10 = arith.maximumf %8, %9 : vector<128x32xf32>
    %11 = arith.truncf %10 : vector<128x32xf32> to vector<128x32xbf16>
    %c0_9 = arith.constant 0 : index
    %c0_10 = arith.constant 0 : index
    %12 = vector.load %arg5[%c0_9, %c0_10] : memref<128x32xbf16, #tpu.memory_space<vmem>>, vector<128x32xbf16>
    tpu.vector_store %arg5[%c0_9, %c0_10], %11 {strides = array<i32>} : memref<128x32xbf16, #tpu.memory_space<vmem>>, vector<128x32xbf16>,
    return
  }
  func.func @transform_0(%arg0: i32) -> (i32, i32) {
    %c0_i32 = arith.constant 0 : i32
    %c0_i32_0 = arith.constant 0 : i32
    return %arg0, %c0_i32 : i32, i32
  }
  func.func @transform_1(%arg0: i32) -> (i32, i32) {
    %c0_i32 = arith.constant 0 : i32
    %c0_i32_0 = arith.constant 0 : i32
    %c0_i32_1 = arith.constant 0 : i32
    return %c0_i32, %c0_i32_0 : i32, i32
  }
  func.func @transform_2(%arg0: i32) -> (i32, i32) {
    %c0_i32 = arith.constant 0 : i32
    %c0_i32_0 = arith.constant 0 : i32
    %c0_i32_1 = arith.constant 0 : i32
    return %c0_i32, %c0_i32_0 : i32, i32
  }
  func.func @transform_3(%arg0: i32) -> (i32, i32) {
    %c0_i32 = arith.constant 0 : i32
    %c0_i32_0 = arith.constant 0 : i32
    %c0_i32_1 = arith.constant 0 : i32
    return %c0_i32, %c0_i32_0 : i32, i32
  }
  func.func @transform_4(%arg0: i32) -> (i32, i32) {
    %c0_i32 = arith.constant 0 : i32
    %c0_i32_0 = arith.constant 0 : i32
    return %arg0, %c0_i32 : i32, i32
  }
}

</mosaic_0001>

<bundles_post_ra>
// kernel: tpu_custom_call.1
= control target key start
LH: loop header
LB: loop body
LE: loop exit
PB: predicated region body
PF: predicated region fallthrough
CT: control target
= control target key end

     0   :  { %9 = vsyncpa [#allocation3], 0  ;;  %s1460_s0 = inlined_call_operand.hbm [shape: bf16[256,256], index: 0, kind: input, shape index: {}]   ;;  %s1461_s1 = inlined_call_operand.vmem [shape: bf16[256,8], index: 1, kind: input, shape index: {}]   ;;  %s1462_s2 = inlined_call_operand.vmem [shape: bf16[8,32], index: 2, kind: input, shape index: {}]   ;;  %s1463_s3 = inlined_call_operand.vmem [shape: f32[1,32], index: 3, kind: input, shape index: {}]   ;;  %s1464_s4 = inlined_call_operand.vmem [shape: bf16[256,32], index: 4, kind: output, shape index: {}]  }
   0x1   :  { %11 = vsyncpa [#allocation3 + $0x1], 0  ;;  %s1221_s15 = smov 0   ;;  %s1223_s16 = smov 0  }
   0x2   :  { %s1225_s17 = smov 0   ;;  %s1227_s18 = smov 0  }
   0x3 LB: > { %s849_s19 = sadd.s32 4294967295, %s1191_s18   ;;  %s1241_s20 = sadd.s32 1, %s1191_s18   ;;  %s1191_s18 = sphi %s1227_s18, %s1471_s18   ;;  %s1187_s17 = sphi %s1225_s17, %s1470_s17   ;;  %s1183_s16 = sphi %s1223_s16, %s1469_s16   ;;  %s1179_s15 = sphi %s1221_s15, %s1468_s15  }
   0x4   : > { %s21_s21 = ssub.s32 %s1191_s18, %s1241_s20  ;;  %s24_s22 = sadd.s32 1, %s1187_s17 }
   0x5   : > { %p22_p0 = scmp.eq.s32.totalorder %s21_s21, 0  ;;  %p31_p1 = scmp.ne.s32.totalorder %s1187_s17, %s1183_s16 }
   0x6   : > { %p32_p2 = scmp.eq.s32.totalorder %s1191_s18, 0  ;;  %p37_p3 = scmp.ne.s32.totalorder %s1183_s16, %s1179_s15 }
   0x7   : > { %s1251_s23 = scalar_select %p22_p0, %s1187_s17, %s24_s22  }
   0x8   : > { %p33_p4 = por %p32_p2, %p31_p1  ;;  %p38_p5 = scmp.eq.s32.totalorder %s849_s19, 0 }
   0x9   : > { %p1052_p6 = scmp.lt.s32.totalorder %s1191_s18, 2  ;;  %s159_s25 = sand.u32 1, %s1187_s17  }
   0xa   : > { %p1256_p7 = por %p38_p5, %p37_p3  ;;  %s853_s26 = sshll.u32 %s159_s25, 7 }
   0xb   : > { %s921_s27 = sshll.u32 %s1191_s18, 11  ;;  %s163_s5 = scalar_lea.vmem [#allocation2], %s853_s26 }
   0xc   : > { %s1265_s30 = scalar_lea.hbm %s1460_s0, %s921_s27  ;;  %s171_s6 = sshll.u32 %s163_s5, 4  ;;  %s1267_s6 = int_to_ptr.vmem [resolvable:$true] %s171_s6 }
   0xd   : > { %p1269_p8 = pnand %p1052_p6, %p33_p4  ;;  %s1274_s8 = scalar_lea.sflag [#allocation3], %s159_s25 }
   0xe   : > { %s1127_s9 = scalar_lea.hbm %s1265_s30, 2048  ;;  %s1132_s12 = scalar_lea.hbm %s1460_s0, 4096 }
   0xf   : > { %p1128_p10 = scmp.ne.s32.totalorder %s1265_s30, %s1127_s9  ;;  %p1129_p11 = pneg %p1269_p8 }
  0x10   : > { %p1133_p0 = scmp.lt.u32.totalorder %s1265_s30, %s1460_s0  ;;  %p1134_p1 = scmp.lt.u32.totalorder %s1132_s12, %s1127_s9 }
  0x11   : > { %p1130_p12 = pnand %p1129_p11, %p1128_p10  ;;  %p1136_p3 = scmp.lt.u32.totalorder %s1127_s9, %s1265_s30 }
  0x12   : > { %p1135_p2 = por %p1134_p1, %p1133_p0 }
  0x13   : > { %p1131_p13 = pneg %p1130_p12 }
  0x14   : > { %p1137_p4 = por %p1136_p3, %p1135_p2 }
  0x16   : > { %p1138_p5 = pnand %p1137_p4, %p1131_p13 }
  0x18   : > { %1141 = shalt.err (!%p1138_p5)
}
  0x19   : > { %s1142_s15 = scalar_lea.vmem %s1267_s6, 2048  ;;  %s1193_s21 = smov [#allocation2]  }
  0x1a   : > { %p1143_p6 = scmp.ne.s32.totalorder %s1267_s6, %s1142_s15  ;;  %s1147_s22 = sshll.u32 %s1193_s21, 4  ;;  %s1148_s22 = int_to_ptr.vmem [resolvable:$false] %s1147_s22 }
  0x1b   : > { %s1149_s25 = scalar_lea.vmem %s1148_s22, 4096  ;;  %p1150_p9 = scmp.lt.s32.totalorder %s1267_s6, %s1148_s22 }
  0x1c   : > { %p1145_p10 = pnand %p1143_p6, %p1129_p11  ;;  %p1151_p0 = scmp.lt.s32.totalorder %s1149_s25, %s1142_s15 }
  0x1e   : > { %p1146_p12 = pneg %p1145_p10  ;;  %p1152_p1 = por %p1151_p0, %p1150_p9 }
  0x20   : > { %p1153_p2 = pnand %p1152_p1, %p1146_p12 }
  0x22   : > { %1156 = shalt.err (!%p1153_p2)
}
  0x23   : > { %s1194_s26 = smov 128   ;;  %s1195_s27 = smov 8  }
  0x24   : > { %1051 = dma.hbm_to_vmem [thread:$0]  (!%p1269_p8), %s1265_s30, 2048, %s1267_s6, %s1274_s8, %s1194_s26, %s1194_s26, %s1195_s27  }
  0x25   : > { %p179_p11 = scmp.lt.s32.totalorder %s1191_s18, 3  ;;  %p1467_p13 = scmp.ge.s32.totalorder %s1191_s18, 1 }
  0x27   : > { %p180_p3 = pnand %p1467_p13, %p179_p11 }
  0x28   : > { %s185_s28 = sand.u32 (!%p180_p3), 1, %s1183_s16  }
  0x29   : > { %183 = sbr.rel (%p180_p3) target bundleno = 571 (0x23b), region = 36  ;;  %s858_s29 = sshll.u32 (!%p180_p3), %s185_s28, 7 }
  0x2a   : > { %s186_s5 = scalar_lea.sflag (!%p180_p3), [#allocation3], %s185_s28  ;;  %s1306_s9 = scalar_lea.vmem (!%p180_p3), [#allocation2], %s858_s29 }
  0x30   : > { %1174 = dma.done.wait (%p1256_p7), %s186_s5, 2048  }
  0x31   : > { %1176 = vsyncadd (%p1256_p7), %s186_s5, 4294965248  ;;  %v1087_v0 = vld [vmem:[%s1461_s1 + $0x40] sm:$0xff]   ;;  %v1089_v2 = vld [vmem:[%s1461_s1 + $0x48] sm:$0xff]   ;;  %vm584_vm0 = vcmask 1043456   ;;  %vm559_vm1 = vcmask 64512   ;;  %vm765_vm2 = vcmask 257024  }
  0x32   : > { %v1088_v1 = vld [vmem:[%s1461_s1] sm:$0xff]   ;;  %938 = vmatprep.subr.bf16.mxu0 %v1087_v0  ;;  %1029 = vmatprep.subr.bf16.mxu1 %v1087_v0  ;;  %v1090_v3 = vld [vmem:[%s1461_s1 + $0x8] sm:$0xff]   ;;  %v1091_v4 = vld [vmem:[%s1461_s1 + $0x50] sm:$0xff]  }
  0x33   : > { %939 = vmatpush3.bf16.msra.mxu0 %v1088_v1  ;;  %1037 = vmatpush3.bf16.msra.mxu1 %v1088_v1  ;;  %v1092_v5 = vld [vmem:[%s1461_s1 + $0x10] sm:$0xff]   ;;  %v1093_v6 = vld [vmem:[%s1461_s1 + $0x58] sm:$0xff]   ;;  %v1095_v8 = vld [vmem:[%s1461_s1 + $0x60] sm:$0xff]  }
  0x34   : > { %940 = vmatprep.subr.bf16.mxu0 %v1089_v2  ;;  %1030 = vmatprep.subr.bf16.mxu1 %v1089_v2  ;;  %v1094_v7 = vld [vmem:[%s1461_s1 + $0x18] sm:$0xff]   ;;  %v1096_v9 = vld [vmem:[%s1461_s1 + $0x20] sm:$0xff]   ;;  %v1097_v10 = vld [vmem:[%s1461_s1 + $0x68] sm:$0xff]  }
  0x35   : > { %v1105_v11 = vld [vmem:[%s1306_s9 + $0x4] ss:$8 sps:$4 sm:$0xff]   ;;  %v1099_v13 = vld [vmem:[%s1461_s1 + $0x70] sm:$0xff]   ;;  %v1101_v16 = vld [vmem:[%s1461_s1 + $0x78] sm:$0xff]  }
  0x36   : > { %v1098_v12 = vld [vmem:[%s1461_s1 + $0x28] sm:$0xff]   ;;  %478 = vmatprep.mubr.bf16.mxu0 %v1105_v11  ;;  %v1100_v14 = vld [vmem:[%s1461_s1 + $0x30] sm:$0xff]   ;;  %v1102_v17 = vld [vmem:[%s1461_s1 + $0x38] sm:$0xff]  }
  0x37   : > { %941 = vmatpush3.bf16.msra.mxu0 %v1090_v3  ;;  %1038 = vmatpush3.bf16.msra.mxu1 %v1090_v3  ;;  %v1120_v15 = vld [vmem:[%s1306_s9 + $0x64] ss:$8 sps:$4 sm:$0xff]   ;;  %v1103_v18 = vld [vmem:[%s1306_s9] ss:$8 sps:$4 sm:$0xff]   ;;  %v1106_v19 = vld [vmem:[%s1306_s9 + $0x14] ss:$8 sps:$4 sm:$0xff]  }
  0x38   : > { %942 = vmatprep.subr.bf16.mxu0 %v1091_v4  ;;  %1031 = vmatprep.subr.bf16.mxu1 %v1091_v4  ;;  %v1118_v20 = vld [vmem:[%s1306_s9 + $0x60] ss:$8 sps:$4 sm:$0xff]   ;;  %v1124_v21 = vld [vmem:[%s1306_s9 + $0x74] ss:$8 sps:$4 sm:$0xff]   ;;  %v1108_v22 = vld [vmem:[%s1306_s9 + $0x10] ss:$8 sps:$4 sm:$0xff]  }
  0x39   : > { %526 = vmatprep.mubr.bf16.mxu1 %v1120_v15  ;;  %v1109_v23 = vld [vmem:[%s1306_s9 + $0x24] ss:$8 sps:$4 sm:$0xff]   ;;  %v1126_v24 = vld [vmem:[%s1306_s9 + $0x70] ss:$8 sps:$4 sm:$0xff]   ;;  %v1111_v25 = vld [vmem:[%s1306_s9 + $0x20] ss:$8 sps:$4 sm:$0xff]  }
  0x3a   : > { %v1112_v26 = vld [vmem:[%s1306_s9 + $0x34] ss:$8 sps:$4 sm:$0xff]   ;;  %v1114_v27 = vld [vmem:[%s1306_s9 + $0x30] ss:$8 sps:$4 sm:$0xff]   ;;  %v1115_v28 = vld [vmem:[%s1306_s9 + $0x44] ss:$8 sps:$4 sm:$0xff]  }
  0x3b   : > { %943 = vmatpush3.bf16.msra.mxu0 %v1092_v5  ;;  %1039 = vmatpush3.bf16.msra.mxu1 %v1092_v5  ;;  %v1117_v29 = vld [vmem:[%s1306_s9 + $0x40] ss:$8 sps:$4 sm:$0xff]   ;;  %v1121_v30 = vld [vmem:[%s1306_s9 + $0x54] ss:$8 sps:$4 sm:$0xff]   ;;  %v1123_v31 = vld [vmem:[%s1306_s9 + $0x50] ss:$8 sps:$4 sm:$0xff]  }
  0x3c   : > { %944 = vmatprep.subr.bf16.mxu0 %v1093_v6  ;;  %1032 = vmatprep.subr.bf16.mxu1 %v1093_v6  ;;  %v551_v32 = vld [vmem:[%s1462_s2] sm:$0xf]  ;;  %s859_s9 = sshll.u32 %s849_s19, 4 }
  0x3d   : > { %v586_v33 = vsel %vm584_vm0, %v551_v32, 0  ;;  %p216_p7 = scmp.lt.s32.totalorder %s859_s9, 31 }
  0x3f   : > { %945 = vmatpush3.bf16.msra.mxu0 %v1094_v7  ;;  %1040 = vmatpush3.bf16.msra.mxu1 %v1094_v7  ;;  %s1473_s9 = smov (!%p216_p7, %s859_s9), 31 }
  0x40   : > { %946 = vmatprep.subr.bf16.mxu0 %v1095_v8  ;;  %1033 = vmatprep.subr.bf16.mxu1 %v1095_v8  ;;  %s860_s29 = sshll.u32 %s1473_s9, 2 }
  0x41   : > { %s1400_s5 = scalar_lea.vmem %s1464_s4, %s860_s29 }
  0x43   : > { %947 = vmatpush3.bf16.msra.mxu0 %v1096_v9  ;;  %1041 = vmatpush3.bf16.msra.mxu1 %v1096_v9 }
  0x44   : > { %948 = vmatprep.subr.bf16.mxu0 %v1097_v10  ;;  %1034 = vmatprep.subr.bf16.mxu1 %v1097_v10 }
  0x47   : > { %949 = vmatpush3.bf16.msra.mxu0 %v1098_v12  ;;  %1042 = vmatpush3.bf16.msra.mxu1 %v1098_v12 }
  0x48   : > { %950 = vmatprep.subr.bf16.mxu0 %v1099_v13  ;;  %1035 = vmatprep.subr.bf16.mxu1 %v1099_v13 }
  0x4b   : > { %951 = vmatpush3.bf16.msra.mxu0 %v1100_v14  ;;  %1043 = vmatpush3.bf16.msra.mxu1 %v1100_v14 }
  0x4c   : > { %952 = vmatprep.subr.bf16.mxu0 %v1101_v16  ;;  %1036 = vmatprep.subr.bf16.mxu1 %v1101_v16 }
  0x4f   : > { %953 = vmatpush3.bf16.msra.mxu0 %v1102_v17  ;;  %1044 = vmatpush3.bf16.msra.mxu1 %v1102_v17 }
  0x50   : > { %1045 = vmatprep.subr.msk.bf16.mxu1 %vm584_vm0, %v551_v32 }
  0x52   : > { %479 = vmatmul.mubr.bf16.vlgmr.msra.gmra.mrb[0].mxu0 %v1103_v18  ;;  %527 = vmatmul.mubr.bf16.vlgmr.msra.gmra.mrb[0].mxu1 %v1118_v20 }
  0x53   : > { %486 = vmatprep.mubr.bf16.mxu0 %v1106_v19  ;;  %534 = vmatprep.mubr.bf16.mxu1 %v1124_v21 }
  0x54   : > { %1012 = vmatpush3.bf16.msra.mxu1 %v586_v33 }
  0x5a   : > { %487 = vmatmul.mubr.bf16.gmra.mrb[4].mxu0 %v1108_v22  ;;  %535 = vmatmul.mubr.bf16.gmra.mrb[4].mxu1 %v1126_v24 }
  0x5b   : > { %494 = vmatprep.mubr.bf16.mxu0 %v1109_v23 }
  0x62   : > { %495 = vmatmul.mubr.bf16.gmra.mrb[8].mxu0 %v1111_v25 }
  0x63   : > { %502 = vmatprep.mubr.bf16.mxu0 %v1112_v26  ;;  %v1392_v26 = vld [vmem:[%s1463_s3] ss:$0 sm:$0xff] }
  0x6a   : > { %503 = vmatmul.mubr.bf16.gmra.mrb[12].mxu0 %v1114_v27 }
  0x6b   : > { %510 = vmatprep.mubr.bf16.mxu0 %v1115_v28 }
  0x72   : > { %511 = vmatmul.mubr.bf16.gmra.mrb[16].mxu0 %v1117_v29 }
  0x73   : > { %518 = vmatprep.mubr.bf16.mxu0 %v1121_v30 }
  0x7a   : > { %519 = vmatmul.mubr.bf16.gmra.mrb[20].mxu0 %v1123_v31 }
 0x125   : > { %v954_v34 = vpop.f32.mrb[0].mxu0  ;;  %v990_v36 = vpop.f32.mrb[0].mxu1 }
 0x126   : > { %v955_v35 = vpop.f32.mrb[1].mxu0  ;;  %v991_v39 = vpop.f32.mrb[1].mxu1 }
 0x127   : > { %v956_v37 = vadd.f32 %v955_v35, %v954_v34  ;;  %v957_v38 = vpop.f32.mrb[2].mxu0  ;;  %v992_v41 = vadd.f32 %v991_v39, %v990_v36  ;;  %v993_v42 = vpop.f32.mrb[2].mxu1 }
 0x128   : > { %v958_v40 = vpop.f32.mrb[3].mxu0  ;;  %v994_v44 = vpop.f32.mrb[3].mxu1 }
 0x129   : > { %v959_v43 = vadd.f32 %v958_v40, %v957_v38  ;;  %v995_v45 = vadd.f32 %v994_v44, %v993_v42 }
 0x12b   : > { %v543_v46 = vpack.c.bf16 %v959_v43, %v956_v37  ;;  %v549_v47 = vpack.c.bf16 %v995_v45, %v992_v41 }
 0x12d   : > { %v960_v48 = vpop.f32.mrb[4].mxu0  ;;  %1013 = vmatprep.mubr.msk.bf16.mxu1 %vm559_vm1, %v543_v46  ;;  %v996_v50 = vpop.f32.mrb[4].mxu1 }
 0x12e   : > { %v961_v49 = vpop.f32.mrb[5].mxu0  ;;  %v997_v53 = vpop.f32.mrb[5].mxu1 }
 0x12f   : > { %v962_v51 = vadd.f32 %v961_v49, %v960_v48  ;;  %v963_v52 = vpop.f32.mrb[6].mxu0  ;;  %v998_v55 = vadd.f32 %v997_v53, %v996_v50  ;;  %v999_v56 = vpop.f32.mrb[6].mxu1 }
 0x130   : > { %v964_v54 = vpop.f32.mrb[7].mxu0  ;;  %v1000_v58 = vpop.f32.mrb[7].mxu1 }
 0x131   : > { %v965_v57 = vadd.f32 %v964_v54, %v963_v52  ;;  %v1001_v59 = vadd.f32 %v1000_v58, %v999_v56 }
 0x133   : > { %v544_v60 = vpack.c.bf16 %v965_v57, %v962_v51  ;;  %v550_v61 = vpack.c.bf16 %v1001_v59, %v998_v55 }
 0x135   : > { %v966_v62 = vpop.f32.mrb[8].mxu0  ;;  %1014 = vmatmul.mubr.msk.bf16.vlgmr.msra.gmra.mrb[8].mxu1 %vm559_vm1, %v544_v60 }
 0x136   : > { %v967_v63 = vpop.f32.mrb[9].mxu0 }
 0x137   : > { %v968_v0 = vadd.f32 %v967_v63, %v966_v62  ;;  %v969_v1 = vpop.f32.mrb[10].mxu0 }
 0x138   : > { %v970_v2 = vpop.f32.mrb[11].mxu0 }
 0x139   : > { %v971_v3 = vadd.f32 %v970_v2, %v969_v1 }
 0x13b   : > { %v545_v4 = vpack.c.bf16 %v971_v3, %v968_v0 }
 0x13d   : > { %v972_v5 = vpop.f32.mrb[12].mxu0  ;;  %1017 = vmatprep.mubr.msk.bf16.mxu1 %vm559_vm1, %v545_v4 }
 0x13e   : > { %v973_v6 = vpop.f32.mrb[13].mxu0 }
 0x13f   : > { %v974_v7 = vadd.f32 %v973_v6, %v972_v5  ;;  %v975_v8 = vpop.f32.mrb[14].mxu0 }
 0x140   : > { %v976_v9 = vpop.f32.mrb[15].mxu0 }
 0x141   : > { %v977_v10 = vadd.f32 %v976_v9, %v975_v8 }
 0x143   : > { %v546_v11 = vpack.c.bf16 %v977_v10, %v974_v7 }
 0x145   : > { %v978_v12 = vpop.f32.mrb[16].mxu0  ;;  %1018 = vmatmul.mubr.msk.bf16.gmra.mrb[12].mxu1 %vm559_vm1, %v546_v11 }
 0x146   : > { %v979_v13 = vpop.f32.mrb[17].mxu0 }
 0x147   : > { %v980_v14 = vadd.f32 %v979_v13, %v978_v12  ;;  %v981_v15 = vpop.f32.mrb[18].mxu0 }
 0x148   : > { %v982_v16 = vpop.f32.mrb[19].mxu0 }
 0x149   : > { %v983_v17 = vadd.f32 %v982_v16, %v981_v15 }
 0x14b   : > { %v547_v18 = vpack.c.bf16 %v983_v17, %v980_v14 }
 0x14d   : > { %v984_v19 = vpop.f32.mrb[20].mxu0  ;;  %1021 = vmatprep.mubr.msk.bf16.mxu1 %vm559_vm1, %v547_v18 }
 0x14e   : > { %v985_v20 = vpop.f32.mrb[21].mxu0 }
 0x14f   : > { %v986_v21 = vadd.f32 %v985_v20, %v984_v19  ;;  %v987_v22 = vpop.f32.mrb[22].mxu0 }
 0x150   : > { %v988_v23 = vpop.f32.mrb[23].mxu0 }
 0x151   : > { %v989_v24 = vadd.f32 %v988_v23, %v987_v22 }
 0x153   : > { %v548_v25 = vpack.c.bf16 %v989_v24, %v986_v21 }
 0x155   : > { %1022 = vmatmul.mubr.msk.bf16.gmra.mrb[16].mxu1 %vm559_vm1, %v548_v25 }
 0x156   : > { %1025 = vmatprep.mubr.msk.bf16.mxu1 %vm559_vm1, %v549_v47 }
 0x15d   : > { %1026 = vmatmul.mubr.msk.bf16.gmra.mrb[20].mxu1 %vm559_vm1, %v550_v61 }
 0x208   : > { %v1015_v27 = vpop.f32.mrb[8].mxu1 }
 0x209   : > { %v631_v28 = vadd.f32 %v1015_v27, %v1392_v26  ;;  %v622_v29 = vpop.f32.mrb[9].mxu1 }
 0x20a   : > { %v623_v30 = vadd.f32 %v1392_v26, %v622_v29  ;;  %v1016_v31 = vpop.f32.mrb[10].mxu1 }
 0x20b   : > { %v687_v32 = vmax.f32 %v631_v28, 0.0  ;;  %v634_v33 = vadd.f32 %v1016_v31, %v1392_v26  ;;  %v625_v34 = vpop.f32.mrb[11].mxu1 }
 0x20c   : > { %v685_v35 = vmax.f32 %v623_v30, 0.0  ;;  %v626_v36 = vadd.f32 %v1392_v26, %v625_v34 }
 0x20d   : > { %v924_v37 = vpack.c.bf16 %v687_v32, %v687_v32  ;;  %v688_v38 = vmax.f32 %v634_v33, 0.0 }
 0x20e   : > { %v922_v39 = vpack.c.bf16 %v685_v35, %v685_v35  ;;  %v686_v40 = vmax.f32 %v626_v36, 0.0 }
 0x20f   : > { %768 = vst.msk [vmem:[%s1400_s5 + $0x8] sm:$0xf] %vm765_vm2, %v924_v37  ;;  %v925_v41 = vpack.c.bf16 %v688_v38, %v688_v38 }
 0x210   : > { %766 = vst.msk [vmem:[%s1400_s5] sm:$0xf] %vm765_vm2, %v922_v39  ;;  %v923_v42 = vpack.c.bf16 %v686_v40, %v686_v40 }
 0x211   : > { %769 = vst.msk [vmem:[%s1400_s5 + $0xc] sm:$0xf] %vm765_vm2, %v925_v41 }
 0x212   : > { %767 = vst.msk [vmem:[%s1400_s5 + $0x4] sm:$0xf] %vm765_vm2, %v923_v42 }
 0x218   : > { %v1019_v43 = vpop.f32.mrb[12].mxu1 }
 0x219   : > { %v647_v44 = vadd.f32 %v1019_v43, %v1392_v26  ;;  %v638_v45 = vpop.f32.mrb[13].mxu1 }
 0x21a   : > { %v639_v46 = vadd.f32 %v1392_v26, %v638_v45  ;;  %v1020_v47 = vpop.f32.mrb[14].mxu1 }
 0x21b   : > { %v691_v48 = vmax.f32 %v647_v44, 0.0  ;;  %v650_v49 = vadd.f32 %v1020_v47, %v1392_v26  ;;  %v641_v50 = vpop.f32.mrb[15].mxu1 }
 0x21c   : > { %v689_v51 = vmax.f32 %v639_v46, 0.0  ;;  %v642_v52 = vadd.f32 %v1392_v26, %v641_v50 }
 0x21d   : > { %v928_v53 = vpack.c.bf16 %v691_v48, %v691_v48  ;;  %v692_v54 = vmax.f32 %v650_v49, 0.0 }
 0x21e   : > { %v926_v55 = vpack.c.bf16 %v689_v51, %v689_v51  ;;  %v690_v56 = vmax.f32 %v642_v52, 0.0 }
 0x21f   : > { %772 = vst.msk [vmem:[%s1400_s5 + $0x18] sm:$0xf] %vm765_vm2, %v928_v53  ;;  %v929_v57 = vpack.c.bf16 %v692_v54, %v692_v54 }
 0x220   : > { %770 = vst.msk [vmem:[%s1400_s5 + $0x10] sm:$0xf] %vm765_vm2, %v926_v55  ;;  %v927_v58 = vpack.c.bf16 %v690_v56, %v690_v56 }
 0x221   : > { %773 = vst.msk [vmem:[%s1400_s5 + $0x1c] sm:$0xf] %vm765_vm2, %v929_v57 }
 0x222   : > { %771 = vst.msk [vmem:[%s1400_s5 + $0x14] sm:$0xf] %vm765_vm2, %v927_v58 }
 0x228   : > { %v1023_v59 = vpop.f32.mrb[16].mxu1 }
 0x229   : > { %v663_v60 = vadd.f32 %v1023_v59, %v1392_v26  ;;  %v654_v61 = vpop.f32.mrb[17].mxu1 }
 0x22a   : > { %v655_v62 = vadd.f32 %v1392_v26, %v654_v61  ;;  %v1024_v63 = vpop.f32.mrb[18].mxu1 }
 0x22b   : > { %v695_v0 = vmax.f32 %v663_v60, 0.0  ;;  %v666_v1 = vadd.f32 %v1024_v63, %v1392_v26  ;;  %v657_v2 = vpop.f32.mrb[19].mxu1 }
 0x22c   : > { %v693_v3 = vmax.f32 %v655_v62, 0.0  ;;  %v658_v4 = vadd.f32 %v1392_v26, %v657_v2 }
 0x22d   : > { %v932_v5 = vpack.c.bf16 %v695_v0, %v695_v0  ;;  %v696_v6 = vmax.f32 %v666_v1, 0.0 }
 0x22e   : > { %v930_v7 = vpack.c.bf16 %v693_v3, %v693_v3  ;;  %v694_v8 = vmax.f32 %v658_v4, 0.0 }
 0x22f   : > { %776 = vst.msk [vmem:[%s1400_s5 + $0x28] sm:$0xf] %vm765_vm2, %v932_v5  ;;  %v933_v9 = vpack.c.bf16 %v696_v6, %v696_v6 }
 0x230   : > { %774 = vst.msk [vmem:[%s1400_s5 + $0x20] sm:$0xf] %vm765_vm2, %v930_v7  ;;  %v931_v10 = vpack.c.bf16 %v694_v8, %v694_v8  ;;  %v1027_v11 = vpop.f32.mrb[20].mxu1 }
 0x231   : > { %777 = vst.msk [vmem:[%s1400_s5 + $0x2c] sm:$0xf] %vm765_vm2, %v933_v9  ;;  %v679_v12 = vadd.f32 %v1027_v11, %v1392_v26  ;;  %v670_v13 = vpop.f32.mrb[21].mxu1 }
 0x232   : > { %775 = vst.msk [vmem:[%s1400_s5 + $0x24] sm:$0xf] %vm765_vm2, %v931_v10  ;;  %v671_v14 = vadd.f32 %v1392_v26, %v670_v13  ;;  %v1028_v15 = vpop.f32.mrb[22].mxu1 }
 0x233   : > { %v699_v16 = vmax.f32 %v679_v12, 0.0  ;;  %v682_v17 = vadd.f32 %v1028_v15, %v1392_v26  ;;  %v673_v18 = vpop.f32.mrb[23].mxu1 }
 0x234   : > { %v697_v19 = vmax.f32 %v671_v14, 0.0  ;;  %v674_v20 = vadd.f32 %v1392_v26, %v673_v18 }
 0x235   : > { %v936_v21 = vpack.c.bf16 %v699_v16, %v699_v16  ;;  %v700_v22 = vmax.f32 %v682_v17, 0.0 }
 0x236   : > { %v934_v23 = vpack.c.bf16 %v697_v19, %v697_v19  ;;  %v698_v24 = vmax.f32 %v674_v20, 0.0 }
 0x237   : > { %780 = vst.msk [vmem:[%s1400_s5 + $0x38] sm:$0xf] %vm765_vm2, %v936_v21  ;;  %v937_v25 = vpack.c.bf16 %v700_v22, %v700_v22 }
 0x238   : > { %778 = vst.msk [vmem:[%s1400_s5 + $0x30] sm:$0xf] %vm765_vm2, %v934_v23  ;;  %v935_v27 = vpack.c.bf16 %v698_v24, %v698_v24 }
 0x239   : > { %781 = vst.msk [vmem:[%s1400_s5 + $0x3c] sm:$0xf] %vm765_vm2, %v937_v25 }
 0x23a   : > { %779 = vst.msk [vmem:[%s1400_s5 + $0x34] sm:$0xf] %vm765_vm2, %v935_v27 }
 0x23b PF: > { %p14_p8 = scmp.ge.s32.totalorder %s1241_s20, 4   ;;  %s1468_s15 = smov %s1183_s16 }
 0x23c   : > { %s1469_s16 = smov %s1187_s17  ;;  %s1470_s17 = smov %s1251_s23 }
 0x23d   : > { %s1471_s18 = smov %s1241_s20  ;;  %16 = sbr.rel (!%p14_p8) target bundleno = 3 (0x3), region = 76 }
 0x244   :  { %804 = vsyncpa [#allocation3], 1 }
 0x245   :  { %806 = vsyncpa [#allocation3 + $0x1], 1 }

</bundles_post_ra>
